<compile_context>
chip_gen: v7x
topology: tpu7x:2x2x1
jax: 0.10.0
libtpu: 0.0.40
codegen_flags: <defaults>
</compile_context>

<pallas_src>
import functools

import jax
import jax.numpy as jnp
from jax.experimental import pallas as pl
from jax.experimental.pallas import tpu as pltpu


_VMEM_LIMIT_BYTES = 32 * 1024 * 1024   # safe scoped-VMEM raise on v5e/v6e/v7x
_VMEM_TILE_BUDGET = 26 * 1024 * 1024   # conservative cap for tile selection


def _image_embedding_kernel(x_ref, w_ref, posb_ref, cls_ref, out_ref, *, mm_dtype):
    """One grid step: project kB whole batches and emit their full output rows.

    x_ref:    (kB, P, S)    patch rows, native dtype (cast in-kernel)
    w_ref:    (S, TH)       projection weight, mm_dtype (resident)
    posb_ref: (P, TH)       position[1:] + bias, f32 (resident)
    cls_ref:  (1, TH)       class_token + position[0], f32 (resident)
    out_ref:  (kB, P+1, TH) full output block (class row + projected body)
    """
    kB, P, S = x_ref.shape
    H = w_ref.shape[1]
    w = w_ref[...]

    if P % 8 == 0 or kB == 1:
        # Flatten (kB, P) into one big-M MXU matmul (layout-free when P is a
        # sublane multiple or the leading dim is a unit squeeze).
        x = x_ref[...].reshape(kB * P, S).astype(mm_dtype)
        proj = jnp.dot(x, w, preferred_element_type=jnp.float32)
        proj = proj.reshape(kB, P, H)
    else:
        # Safe fallback: batched matmul, avoids a sublane-crossing reshape.
        x = x_ref[...].astype(mm_dtype)
        proj = jnp.einsum("bps,sh->bph", x, w,
                          preferred_element_type=jnp.float32)

    body = proj + posb_ref[...][None, :, :]            # f32 epilogue
    out_ref[:, 1:, :] = body.astype(out_ref.dtype)

    cls = jnp.broadcast_to(cls_ref[...][None, :, :], (kB, 1, H))
    out_ref[:, 0:1, :] = cls.astype(out_ref.dtype)


def _pick_batch_group(B, P, S, H, x_isz, mm_isz, out_isz,
                      row_target=512, vmem_budget=_VMEM_TILE_BUDGET):
    """Pick kB = batches per grid step.

    Constraints / preferences:
      * kB divides B.
      * conservative (everything double-buffered) VMEM estimate fits budget.
      * keep >= 2 grid steps so v7x's two TensorCores both get work.
      * kB*P near `row_target`, ties -> larger; small bonus for 256-multiples
        (v6e/v7x MXU M-pass is 256).
    """
    def vmem_need(k):
        return 2 * (k * P * S * x_isz                 # x tile
                    + k * (P + 1) * H * out_isz       # output tile
                    + S * H * mm_isz                  # weight (resident)
                    + (P + 1) * H * 4)                # posb + cls (resident)

    best_k, best_score = 1, None
    for k in range(1, B + 1):
        if B % k:
            continue
        if k > 1 and vmem_need(k) > vmem_budget:
            continue
        rows = k * P
        two_steps_ok = (B // k >= 2) or (B == 1)
        score = (
            0 if two_steps_ok else 1,
            abs(rows - row_target) - (32 if rows % 256 == 0 else 0),
            -rows,
        )
        if best_score is None or score < best_score:
            best_k, best_score = k, score
    return best_k


def image_embedding(x, w, b, class_token, position, *, compute_dtype=None,
                    out_dtype=None, row_tile_target=512):
    """Pallas ImageEmbedding forward.

    x:           (B, P, S)   patchified images
    w:           (S, H)      projection weight (already transposed: y = x @ w)
    b:           (H,)        projection bias
    class_token: (1, H)
    position:    (P+1, H) or (1, P+1, H)
    returns:     (B, P+1, H) in `out_dtype` (default: x.dtype)
    """
    B, P, S = x.shape
    H = w.shape[1]
    out_dtype = x.dtype if out_dtype is None else out_dtype
    mm_dtype = x.dtype if compute_dtype is None else compute_dtype

    # ---- parameter prep (small tensors only; x stays untouched in HBM) -----
    pos_f32 = position.reshape(P + 1, H).astype(jnp.float32)
    posb = pos_f32[1:] + b.astype(jnp.float32)[None, :]              # (P, H)
    cls_row = class_token.astype(jnp.float32).reshape(1, H) + pos_f32[0:1]
    w_mm = w.astype(mm_dtype)                                        # (S, H)

    isz = lambda dt: jnp.dtype(dt).itemsize

    # ---- tiling: groups of whole batches (rows) x optional H (N) split -----
    kB = _pick_batch_group(B, P, S, H, isz(x.dtype), isz(mm_dtype),
                           isz(out_dtype), row_target=row_tile_target)
    n_row_blocks = B // kB
    n_h = 1
    if n_row_blocks < 2 and H % 256 == 0:
        # Single row block (e.g. B == 1): give the second TensorCore work by
        # splitting the output columns instead.
        n_h = 2
    TH = H // n_h

    cost = pl.CostEstimate(
        flops=2 * B * P * S * H,
        transcendentals=0,
        bytes_accessed=(B * P * S * isz(x.dtype)          # x (read once)
                        + S * H * isz(mm_dtype)           # weight (once)
                        + (P + 1) * H * 4                 # posb + cls (once)
                        + B * (P + 1) * H * isz(out_dtype)),  # fused output
    )

    kernel = functools.partial(_image_embedding_kernel, mm_dtype=mm_dtype)

    out = pl.pallas_call(
        kernel,
        out_shape=jax.ShapeDtypeStruct((B, P + 1, H), out_dtype),
        grid_spec=pltpu.PrefetchScalarGridSpec(
            num_scalar_prefetch=0,
            grid=(n_row_blocks, n_h),
            in_specs=[
                pl.BlockSpec((kB, P, S), lambda i, j: (i, 0, 0)),   # x tile
                pl.BlockSpec((S, TH), lambda i, j: (0, j)),         # weight
                pl.BlockSpec((P, TH), lambda i, j: (0, j)),         # pos + bias
                pl.BlockSpec((1, TH), lambda i, j: (0, j)),         # class row
            ],
            out_specs=pl.BlockSpec((kB, P + 1, TH), lambda i, j: (i, 0, j)),
        ),
        compiler_params=pltpu.CompilerParams(
            dimension_semantics=("parallel", "parallel"),
            vmem_limit_bytes=_VMEM_LIMIT_BYTES,
        ),
        cost_estimate=cost,
    )(x, w_mm, posb, cls_row)

    return out


def reference(x, w, b, class_token, position):
    """Plain-JAX reference mirroring the PyTorch forward (eval mode)."""
    B = x.shape[0]
    H = w.shape[1]
    res = jnp.einsum("bps,sh->bph", x, w) + b
    cls = jnp.broadcast_to(class_token.reshape(1, 1, H), (B, 1, H))
    res = jnp.concatenate([cls, res], axis=1)
    return res + position.reshape(1, -1, H)


if __name__ == "__main__":
    # Small shapes consistent with the module:
    #   size (patch dim) = 32, hidden = 32, num_patches = 8, batch = 2
    B, P, S, H = 2, 8, 32, 32

    key = jax.random.PRNGKey(0)
    kx, kw, kb, kc, kp = jax.random.split(key, 5)

    x = jax.random.normal(kx, (B, P, S), dtype=jnp.float32)
    w = jax.random.normal(kw, (S, H), dtype=jnp.float32) * (1.0 / jnp.sqrt(S))
    b = jax.random.normal(kb, (H,), dtype=jnp.float32) * 0.01
    class_token = jax.random.uniform(kc, (1, H), dtype=jnp.float32)      # torch.rand
    position = jax.random.uniform(kp, (1, P + 1, H), dtype=jnp.float32)  # torch.rand

    ref = jax.block_until_ready(reference(x, w, b, class_token, position))

    # f32 path (exact-ish match).
    out = jax.block_until_ready(image_embedding(x, w, b, class_token, position))
    assert out.shape == (B, P + 1, H), out.shape
    assert jnp.allclose(out, ref, atol=1e-5, rtol=1e-5), "f32 mismatch vs reference"

    # bf16 compute path (MXU fast path on all generations, f32 accumulation).
    out_bf16 = jax.block_until_ready(
        image_embedding(x, w, b, class_token, position,
                        compute_dtype=jnp.bfloat16))
    assert out_bf16.shape == (B, P + 1, H), out_bf16.shape
    assert jnp.allclose(out_bf16, ref, atol=1e-1, rtol=1e-1), "bf16 mismatch vs reference"

    # bf16 output stream (halves the dominant HBM write when downstream is bf16).
    out_bf16o = jax.block_until_ready(
        image_embedding(x, w, b, class_token, position,
                        compute_dtype=jnp.bfloat16, out_dtype=jnp.bfloat16))
    assert out_bf16o.dtype == jnp.bfloat16
    assert jnp.allclose(out_bf16o.astype(jnp.float32), ref, atol=1e-1, rtol=1e-1), \
        "bf16-out mismatch vs reference"

    print("KERNEL_OK")
</pallas_src>

<mosaic_0001>
module attributes {stable_mosaic.version = 11 : i64} {
  func.func @_image_embedding_kernel(%arg0: i32, %arg1: i32, %arg2: memref<1x8x32xf32, #tpu.memory_space<vmem>>, %arg3: memref<32x32xf32, #tpu.memory_space<vmem>>, %arg4: memref<8x32xf32, #tpu.memory_space<vmem>>, %arg5: memref<1x32xf32, #tpu.memory_space<vmem>>, %arg6: memref<1x9x32xf32, #tpu.memory_space<vmem>>) attributes {dimension_semantics = [#tpu.dimension_semantics<parallel>, #tpu.dimension_semantics<parallel>], iteration_bounds = array<i64: 2, 1>, scalar_prefetch = 0 : i64, scratch_operands = 0 : i64, tpu.core_type = #tpu.core_type<tc>, window_params = [{transform_indices = @transform_0, window_bounds = array<i64: 1, 8, 32>}, {transform_indices = @transform_1, window_bounds = array<i64: 32, 32>}, {transform_indices = @transform_2, window_bounds = array<i64: 8, 32>}, {transform_indices = @transform_3, window_bounds = array<i64: 1, 32>}, {transform_indices = @transform_4, window_bounds = array<i64: 1, 9, 32>}]} {
    %c0 = arith.constant 0 : index
    %c0_0 = arith.constant 0 : index
    %0 = vector.load %arg3[%c0, %c0_0] : memref<32x32xf32, #tpu.memory_space<vmem>>, vector<32x32xf32>
    %c0_1 = arith.constant 0 : index
    %c0_2 = arith.constant 0 : index
    %c0_3 = arith.constant 0 : index
    %1 = vector.load %arg2[%c0_1, %c0_2, %c0_3] : memref<1x8x32xf32, #tpu.memory_space<vmem>>, vector<1x8x32xf32>
    %2 = vector.shape_cast %1 : vector<1x8x32xf32> to vector<8x32xf32>
    %cst = arith.constant dense<0.000000e+00> : vector<8x32xf32>
    %3 = tpu.matmul %2, %0, %cst {dimension_numbers = #tpu.dot_dimension_numbers<[1], [0], [0], [1], [0, 0, 1, 1], [], []>} : vector<8x32xf32>, vector<32x32xf32>, vector<8x32xf32> -> vector<8x32xf32>
    %4 = vector.shape_cast %3 : vector<8x32xf32> to vector<1x8x32xf32>
    %c0_4 = arith.constant 0 : index
    %c0_5 = arith.constant 0 : index
    %5 = vector.load %arg4[%c0_4, %c0_5] : memref<8x32xf32, #tpu.memory_space<vmem>>, vector<8x32xf32>
    %6 = vector.shape_cast %5 : vector<8x32xf32> to vector<1x8x32xf32>
    %7 = arith.addf %4, %6 : vector<1x8x32xf32>
    %c0_6 = arith.constant 0 : index
    %c1 = arith.constant 1 : index
    %c0_7 = arith.constant 0 : index
    %8 = vector.load %arg6[%c0_6, %c1, %c0_7] : memref<1x9x32xf32, #tpu.memory_space<vmem>>, vector<1x8x32xf32>
    tpu.vector_store %arg6[%c0_6, %c1, %c0_7], %7 {strides = array<i32>} : memref<1x9x32xf32, #tpu.memory_space<vmem>>, vector<1x8x32xf32>,
    %c0_8 = arith.constant 0 : index
    %c0_9 = arith.constant 0 : index
    %9 = vector.load %arg5[%c0_8, %c0_9] : memref<1x32xf32, #tpu.memory_space<vmem>>, vector<1x32xf32>
    %10 = vector.shape_cast %9 : vector<1x32xf32> to vector<1x1x32xf32>
    %c0_10 = arith.constant 0 : index
    %c0_11 = arith.constant 0 : index
    %c0_12 = arith.constant 0 : index
    %11 = vector.load %arg6[%c0_10, %c0_11, %c0_12] : memref<1x9x32xf32, #tpu.memory_space<vmem>>, vector<1x1x32xf32>
    tpu.vector_store %arg6[%c0_10, %c0_11, %c0_12], %10 {strides = array<i32>} : memref<1x9x32xf32, #tpu.memory_space<vmem>>, vector<1x1x32xf32>,
    return
  }
  func.func @transform_0(%arg0: i32, %arg1: i32) -> (i32, i32, i32) {
    %c0_i32 = arith.constant 0 : i32
    %c0_i32_0 = arith.constant 0 : i32
    %c0_i32_1 = arith.constant 0 : i32
    return %arg0, %c0_i32, %c0_i32_0 : i32, i32, i32
  }
  func.func @transform_1(%arg0: i32, %arg1: i32) -> (i32, i32) {
    %c0_i32 = arith.constant 0 : i32
    %c0_i32_0 = arith.constant 0 : i32
    return %c0_i32, %arg1 : i32, i32
  }
  func.func @transform_2(%arg0: i32, %arg1: i32) -> (i32, i32) {
    %c0_i32 = arith.constant 0 : i32
    %c0_i32_0 = arith.constant 0 : i32
    return %c0_i32, %arg1 : i32, i32
  }
  func.func @transform_3(%arg0: i32, %arg1: i32) -> (i32, i32) {
    %c0_i32 = arith.constant 0 : i32
    %c0_i32_0 = arith.constant 0 : i32
    return %c0_i32, %arg1 : i32, i32
  }
  func.func @transform_4(%arg0: i32, %arg1: i32) -> (i32, i32, i32) {
    %c0_i32 = arith.constant 0 : i32
    %c0_i32_0 = arith.constant 0 : i32
    return %arg0, %c0_i32, %arg1 : i32, i32, i32
  }
}

</mosaic_0001>

<bundles_post_ra>
// kernel: tpu_custom_call.1
= control target key start
LH: loop header
LB: loop body
LE: loop exit
PB: predicated region body
PF: predicated region fallthrough
CT: control target
= control target key end

     0   :  { %9 = vsyncpa [#allocation3], 0  ;;  %s989_s0 = inlined_call_operand.hbm [shape: f32[2,8,32], index: 0, kind: input, shape index: {}]   ;;  %s990_s1 = inlined_call_operand.hbm [shape: f32[32,32], index: 1, kind: input, shape index: {}]   ;;  %s991_s2 = inlined_call_operand.hbm [shape: f32[8,32], index: 2, kind: input, shape index: {}]   ;;  %s992_s3 = inlined_call_operand.vmem [shape: f32[1,32], index: 3, kind: input, shape index: {}]   ;;  %s993_s4 = inlined_call_operand.vmem [shape: f32[2,9,32], index: 4, kind: output, shape index: {}]  }
   0x1   :  { %11 = vsyncpa [#allocation3 + $0x1], 0 }
   0x2   :  { %12 = vsyncpa [#allocation5], 0  ;;  %s796_s15 = smov 0   ;;  %s798_s16 = smov 0  }
   0x3   :  { %s800_s17 = smov 0   ;;  %s802_s18 = smov 0  }
   0x4   :  { %s804_s19 = smov 0   ;;  %s806_s20 = smov 0  }
   0x5 LB: > { %s499_s21 = sadd.s32 4294967295, %s761_s20   ;;  %p50_p0 = scmp.ne.s32.totalorder %s745_s16, %s741_s15  ;;  %s761_s20 = sphi %s806_s20, %s18_s20   ;;  %s757_s19 = sphi %s804_s19, %s1011_s19   ;;  %s753_s18 = sphi %s802_s18, %s1010_s18   ;;  %s749_s17 = sphi %s800_s17, %s1009_s17   ;;  %s745_s16 = sphi %s798_s16, %s1008_s16   ;;  %s741_s15 = sphi %s796_s15, %s1007_s15  }
   0x6   : > { %p826_p1 = scmp.eq.s32.totalorder %s499_s21, 0  ;;  %p501_p2 = scmp.ge.s32.totalorder %s761_s20, 1 }
   0x7   : > { %p167_p3 = scmp.lt.s32.totalorder %s761_s20, 3  ;;  %s763_s25 = smov [#allocation4]  }
   0x8   : > { %s998_s22 = scalar_select %p826_p1, 1, 0 }
   0x9   : > { %p834_p4 = por %p826_p1, %p50_p0  ;;  %p838_p5 = pnand %p501_p2, %p167_p3 }
   0xa   : > { %s181_s26 = sshll.u32 %s763_s25, 4  ;;  %s764_s28 = smov [#allocation6]   ;;  %s182_s26 = int_to_ptr.vmem [resolvable:$true] %s181_s26 }
   0xb   : > { %s999_s23 = scalar_select %p834_p4, 1, 0 }
   0xc   : > { %s1000_s24 = scalar_select %p838_p5, 1, 0 }
   0xd   : > { %p550_p6 = pneg %p838_p5  ;;  %s197_s29 = sshll.u32 %s764_s28, 4  ;;  %s850_s29 = int_to_ptr.vmem [resolvable:$true] %s197_s29 }
   0xe   : > { %s621_s6 = scalar_lea.hbm %s990_s1, 512 }
   0xf   : > { %p846_p7 = pnand %p550_p6, %p826_p1  ;;  %p622_p8 = scmp.ne.s32.totalorder %s990_s1, %s621_s6 }
  0x10   : > { %p628_p12 = scmp.lt.u32.totalorder %s621_s6, %s990_s1 }
  0x11   : > { %p623_p9 = pneg %p846_p7 }
  0x13   : > { %p624_p10 = pnand %p623_p9, %p622_p8 }
  0x15   : > { %p625_p11 = pneg %p624_p10 }
  0x17   : > { %p630_p13 = pnand %p628_p12, %p625_p11 }
  0x19   : > { %633 = shalt.err (!%p630_p13)
}
  0x1a   : > { %s634_s11 = scalar_lea.vmem %s182_s26, 512  ;;  %p642_p6 = scmp.lt.s32.totalorder %s182_s26, %s182_s26 }
  0x1b   : > { %p635_p0 = scmp.ne.s32.totalorder %s182_s26, %s634_s11  ;;  %p643_p1 = scmp.lt.s32.totalorder %s634_s11, %s634_s11 }
  0x1d   : > { %p637_p2 = pnand %p635_p0, %p623_p9  ;;  %p644_p4 = por %p643_p1, %p642_p6 }
  0x1f   : > { %p638_p3 = pneg %p637_p2 }
  0x21   : > { %p645_p5 = pnand %p644_p4, %p638_p3 }
  0x23   : > { %648 = shalt.err (!%p645_p5)
}
  0x24   : > { %s765_s12 = smov 128   ;;  %s766_s13 = smov 8  }
  0x25   : > { %553 = dma.hbm_to_vmem [thread:$0]  (!%p846_p7), %s990_s1, 512, %s182_s26, [#allocation5], %s765_s12, %s765_s12, %s766_s13  }
  0x26   : > { %s649_s28 = scalar_lea.hbm %s991_s2, 128 }
  0x27   : > { %p650_p8 = scmp.ne.s32.totalorder %s991_s2, %s649_s28  ;;  %p656_p5 = scmp.lt.u32.totalorder %s649_s28, %s991_s2 }
  0x29   : > { %p652_p1 = pnand %p650_p8, %p623_p9 }
  0x2b   : > { %p653_p4 = pneg %p652_p1 }
  0x2d   : > { %p658_p10 = pnand %p656_p5, %p653_p4 }
  0x2f   : > { %661 = shalt.err (!%p658_p10)
}
  0x30   : > { %s662_s26 = scalar_lea.vmem %s850_s29, 128  ;;  %p670_p0 = scmp.lt.s32.totalorder %s850_s29, %s850_s29 }
  0x31   : > { %p663_p11 = scmp.ne.s32.totalorder %s850_s29, %s662_s26  ;;  %p671_p2 = scmp.lt.s32.totalorder %s662_s26, %s662_s26 }
  0x33   : > { %p665_p12 = pnand %p663_p11, %p623_p9  ;;  %p672_p3 = por %p671_p2, %p670_p0 }
  0x35   : > { %p666_p13 = pneg %p665_p12 }
  0x37   : > { %p673_p6 = pnand %p672_p3, %p666_p13 }
  0x39   : > { %676 = shalt.err (!%p673_p6)
}
  0x3a   : > { %556 = dma.hbm_to_vmem [thread:$0]  (!%p846_p7), %s991_s2, 128, %s850_s29, [#allocation5]  }
  0x3b   : > { %s30_s10 = sadd.s32 1, %s757_s19  ;;  %s37_s11 = sadd.s32 1, %s749_s17 }
  0x3c   : > { %p32_p9 = scmp.ge.s32.totalorder %s30_s10, 2  ;;  %p44_p8 = scmp.ne.s32.totalorder %s749_s17, %s745_s16 }
  0x3d   : > { %p45_p1 = scmp.eq.s32.totalorder %s761_s20, 0  ;;  %p563_p4 = scmp.lt.s32.totalorder %s761_s20, 2 }
  0x3e   : > { %s1013_s10 = smov (%p32_p9, %s30_s10), 0  ;;  %s214_s27 = sand.u32 1, %s749_s17  }
  0x3f   : > { %p46_p5 = por %p45_p1, %p44_p8  ;;  %s34_s12 = ssub.s32 %s757_s19, %s1013_s10 }
  0x40   : > { %p35_p10 = scmp.eq.s32.totalorder %s34_s12, 0  ;;  %s506_s13 = sshll.u32 %s214_s27, 3 }
  0x41   : > { %s507_s14 = sshll.u32 %s757_s19, 7  ;;  %s218_s28 = scalar_lea.vmem [#allocation2], %s506_s13 }
  0x42   : > { %s912_s15 = scalar_select %p35_p10, %s749_s17, %s37_s11  }
  0x43   : > { %s917_s25 = scalar_lea.hbm %s989_s0, %s507_s14  ;;  %s225_s30 = sshll.u32 %s218_s28, 4  ;;  %s919_s30 = int_to_ptr.vmem [resolvable:$true] %s225_s30 }
  0x44   : > { %p923_p7 = pnand %p563_p4, %p46_p5  ;;  %s215_s6 = scalar_lea.sflag [#allocation3], %s214_s27 }
  0x45   : > { %s677_s7 = scalar_lea.hbm %s917_s25, 128  ;;  %s682_s9 = scalar_lea.hbm %s989_s0, 256 }
  0x46   : > { %p678_p11 = scmp.ne.s32.totalorder %s917_s25, %s677_s7  ;;  %p679_p12 = pneg %p923_p7 }
  0x47   : > { %p683_p2 = scmp.lt.u32.totalorder %s917_s25, %s989_s0  ;;  %p684_p3 = scmp.lt.u32.totalorder %s682_s9, %s677_s7 }
  0x48   : > { %p680_p13 = pnand %p679_p12, %p678_p11  ;;  %p686_p9 = scmp.lt.u32.totalorder %s677_s7, %s917_s25 }
  0x49   : > { %p685_p6 = por %p684_p3, %p683_p2 }
  0x4a   : > { %p681_p0 = pneg %p680_p13 }
  0x4b   : > { %p687_p8 = por %p686_p9, %p685_p6 }
  0x4d   : > { %p688_p1 = pnand %p687_p8, %p681_p0 }
  0x4f   : > { %691 = shalt.err (!%p688_p1)
}
  0x50   : > { %s692_s27 = scalar_lea.vmem %s919_s30, 128  ;;  %s767_s13 = smov [#allocation2]  }
  0x51   : > { %p693_p4 = scmp.ne.s32.totalorder %s919_s30, %s692_s27  ;;  %s697_s14 = sshll.u32 %s767_s13, 4  ;;  %s698_s14 = int_to_ptr.vmem [resolvable:$false] %s697_s14 }
  0x52   : > { %s699_s21 = scalar_lea.vmem %s698_s14, 256  ;;  %p700_p11 = scmp.lt.s32.totalorder %s919_s30, %s698_s14 }
  0x53   : > { %p695_p5 = pnand %p693_p4, %p679_p12  ;;  %p701_p13 = scmp.lt.s32.totalorder %s699_s21, %s692_s27 }
  0x55   : > { %p696_p10 = pneg %p695_p5  ;;  %p702_p2 = por %p701_p13, %p700_p11 }
  0x57   : > { %p703_p3 = pnand %p702_p2, %p696_p10 }
  0x59   : > { %706 = shalt.err (!%p703_p3)
}
  0x5a   : > { %560 = dma.hbm_to_vmem [thread:$0]  (!%p923_p7), %s917_s25, 128, %s919_s30, %s215_s6  }
  0x5b   : > { %p1003_p0 = scmp.ne.s32.totalorder %s1000_s24, 0 }
  0x5c   : > { %s236_s29 = sand.u32 (!%p1003_p0), 1, %s745_s16   ;;  %p1004_p12 = scmp.ne.s32.totalorder (!%p1003_p0), %s999_s23, 0 }
  0x5d   : > { %234 = sbr.rel (%p1003_p0) target bundleno = 330 (0x14a), region = 36  ;;  %s509_s28 = sshll.u32 (!%p1003_p0), %s236_s29, 3 }
  0x5e   : > { %s237_s7 = scalar_lea.sflag (!%p1003_p0), [#allocation3], %s236_s29  ;;  %s240_s26 = scalar_lea.vmem (!%p1003_p0), [#allocation2], %s509_s28 }
  0x64   : > { %732 = dma.done.wait (%p1004_p12), %s237_s7, 128  }
  0x65   : > { %734 = vsyncadd (%p1004_p12), %s237_s7, 4294967168  ;;  %p1005_p6 = scmp.ne.s32.totalorder %s998_s22, 0 }
  0x67   : > { %736 = dma.done.wait (%p1005_p6), [#allocation5], 640  }
  0x68   : > { %738 = vsyncadd (%p1005_p6), [#allocation5], 4294966656  ;;  %v768_v0 = vmov 0.0|0.0   ;;  %vm769_vm0 = vmmov 0   ;;  %v770_v1 = vmov 0.0   ;;  %v290_v2 = vld [vmem:[#allocation4] sm:$0xff] }
  0x69   : > { %534 = vmatprep.subr.bf16.mxu0 %v768_v0  ;;  %531 = vmatprep.mubr.msk.f32.mxu0 %vm769_vm0, %v770_v1  ;;  %v291_v3 = vld [vmem:[#allocation4 + $0x8] sm:$0xff]  ;;  %v292_v4 = vld [vmem:[#allocation4 + $0x10] sm:$0xff]  ;;  %v293_v6 = vld [vmem:[#allocation4 + $0x18] sm:$0xff]  ;;  %vm295_vm1 = vcmask 261120   ;;  %p282_p7 = scmp.lt.s32.totalorder %s753_s18, 1  ;;  %vm373_vm2 = vcmask 253952  }
  0x6a   : > { %v535_v5 = vpack.c.bf16 %v291_v3, %v290_v2  ;;  %v538_v7 = vpack.c.bf16 %v293_v6, %v292_v4  ;;  %v294_v8 = vld [vmem:[%s240_s26] sm:$0xff]  ;;  %v369_v10 = vld [vmem:[#allocation6] sm:$0xff] }
  0x6b   : > { %s1015_s18 = smov (!%p282_p7, %s753_s18), 1  ;;  %v372_v9 = vld [vmem:[%s992_s3] sm:$0x1] }
  0x6c   : > { %536 = vmatpush3.bf16.msra.mxu0 %v535_v5  ;;  %s517_s22 = sshll.u32 %s1015_s18, 4 }
  0x6d   : > { %537 = vmatprep.subr.bf16.mxu0 %v768_v0  ;;  %s289_s25 = scalar_lea.vmem %s993_s4, %s517_s22 }
  0x6e   : > { %374 = vst.msk [vmem:[%s289_s25] sm:$0x1] %vm373_vm2, %v372_v9 }
  0x70   : > { %539 = vmatpush3.bf16.msra.mxu0 %v538_v7 }
  0x73   : > { %532 = vmatmul.mubr.msk.f32.vlgmr.msra.gmra.mrb[0].mxu0 %vm295_vm1, %v294_v8 }
 0x146   : > { %v365_v11 = vpop.f32.mrb[0].mxu0 }
 0x147   : > { %v370_v12 = vadd.f32 %v369_v10, %v365_v11  ;;  %v533_v13 = vpop.f32.mrb[1].mxu0 }
 0x149   : > { %371 = vst.msk [vmem:[%s289_s25 + $0x1] sm:$0xff] %vm295_vm1, %v370_v12 }
 0x14a PF: > { %s18_s20 = sadd.s32 1, %s761_s20   ;;  %s1006_s18 = smov %s912_s15 }
 0x14b   : > { %p15_p9 = scmp.ge.s32.totalorder %s18_s20, 4   ;;  %s1007_s15 = smov %s745_s16 }
 0x14c   : > { %s1008_s16 = smov %s749_s17  ;;  %s1009_s17 = smov %s1006_s18 }
 0x14d   : > { %s1010_s18 = smov %s757_s19  ;;  %s1011_s19 = smov %s1013_s10 }
 0x14e   :  { %17 = sbr.rel (!%p15_p9) target bundleno = 5 (0x5), region = 89 }
 0x155   :  { %402 = vsyncpa [#allocation3], 1 }
 0x156   :  { %404 = vsyncpa [#allocation3 + $0x1], 1 }
 0x157   :  { %405 = vsyncpa [#allocation5], 1 }

</bundles_post_ra>
